<compile_context>
chip_gen: v7x
topology: tpu7x:2x2x1
jax: 0.10.0
libtpu: 0.0.40
codegen_flags: <defaults>
</compile_context>

<pallas_src>
import functools

import jax
import jax.numpy as jnp
from jax import lax
from jax.experimental import pallas as pl
from jax.experimental.pallas import tpu as pltpu


def _round_up(x, m):
    return ((x + m - 1) // m) * m


def _lstm_kernel(seq_len, b_pad, hidden,
                 x_ref, wih_ref, whh_ref, b_ref,
                 hc_out_ref, gx_scr):
    """Whole LSTM sequence in one invocation (no grid).

    x_ref:      (seq_len*b_pad, e_pad)    time-major input, flattened + padded
    wih_ref:    (e_pad, 4*hidden)         W_ih^T, gate order [i, f, o, g]
    whh_ref:    (hidden, 4*hidden)        W_hh^T, gate order [i, f, o, g]
    b_ref:      (1, 4*hidden)             b_ih + b_hh, gate order [i, f, o, g]
    hc_out_ref: (b_pad, 2*hidden)         [h_n | c_n], written exactly once
    gx_scr:     (seq_len*b_pad, 4*hidden) hoisted input projection
    """
    # Preamble: one batched MXU matmul covers every timestep's input
    # projection (M = seq_len*b_pad); the serial loop only consumes rows.
    gx_scr[...] = (
        jnp.dot(x_ref[...], wih_ref[...], preferred_element_type=jnp.float32)
        + b_ref[...])

    # Hoist the recurrent weight out of the unrolled loop so it stays resident
    # across the serial chain (16 vregs) instead of being re-loaded per step.
    # TODO(synk): could pin it in the MXU via pltpu.matmul_push_rhs /
    # matmul_acc_lhs / matmul_pop; hoisting the load is the portable subset.
    whh = whh_ref[...]

    def step(t, carry):
        h, c = carry
        row = pl.multiple_of(t * b_pad, b_pad)            # sublane-aligned
        gates = gx_scr[pl.ds(row, b_pad), :] + jnp.dot(
            h, whh, preferred_element_type=jnp.float32)    # (b_pad, 4*hidden)
        # [i, f, o, g] packing: one sigmoid over 3*hidden, one tanh for g.
        ifo = jax.nn.sigmoid(gates[:, :3 * hidden])
        g_g = jnp.tanh(gates[:, 3 * hidden:])
        i_g = ifo[:, :hidden]
        f_g = ifo[:, hidden:2 * hidden]
        o_g = ifo[:, 2 * hidden:]
        c_new = f_g * c + i_g * g_g
        h_new = o_g * jnp.tanh(c_new)
        return h_new, c_new

    h0 = jnp.zeros((b_pad, hidden), jnp.float32)
    c0 = jnp.zeros((b_pad, hidden), jnp.float32)
    h_fin, c_fin = lax.fori_loop(0, seq_len, step, (h0, c0), unroll=True)

    # Single lane-dense (b_pad, 2*hidden) store of the final state.
    hc_out_ref[...] = jnp.concatenate([h_fin, c_fin], axis=1)


def pack_encoder_params(w_ih, w_hh, b_ih, b_hh):
    """One-time packing of torch-layout LSTM params (call at init, NOT per call).

    Repacks gate order [i, f, g, o] -> [i, f, o, g] so the kernel activates
    i/f/o with a single sigmoid over a contiguous slab, transposes the weights
    for right-multiplication, and zero-pads W_ih^T rows to the padded
    embedding width used by the kernel.
    """
    hidden = w_hh.shape[1]
    emb = w_ih.shape[1]
    e_pad = _round_up(emb, 8)

    def reorder(m):  # (..., 4*hidden) [i,f,g,o] -> [i,f,o,g]
        i = m[..., 0 * hidden:1 * hidden]
        f = m[..., 1 * hidden:2 * hidden]
        g = m[..., 2 * hidden:3 * hidden]
        o = m[..., 3 * hidden:4 * hidden]
        return jnp.concatenate([i, f, o, g], axis=-1)

    wih_p = reorder(w_ih.T.astype(jnp.float32))              # (emb, 4*hidden)
    wih_p = jnp.pad(wih_p, ((0, e_pad - emb), (0, 0)))       # zero pad rows
    whh_p = reorder(w_hh.T.astype(jnp.float32))              # (hidden, 4*hidden)
    bias_p = reorder((b_ih + b_hh).astype(jnp.float32)[None, :])  # (1, 4*hidden)
    return wih_p, whh_p, bias_p


@jax.jit
def encoder_forward_packed(inputs, wih_p, whh_p, bias_p):
    """Hot path. inputs: (seq_len, batch, emb); packed params from
    pack_encoder_params. Returns (h_n, c_n), each (1, batch, hidden)."""
    seq_len, batch, emb = inputs.shape
    hidden = whh_p.shape[0]
    e_pad = wih_p.shape[0]
    b_pad = _round_up(batch, 8)

    # Single pad (+ free contiguous reshape) -> (seq_len*b_pad, e_pad).
    x_p = jnp.pad(inputs.astype(jnp.float32),
                  ((0, 0), (0, b_pad - batch), (0, e_pad - emb)))
    x_p = x_p.reshape(seq_len * b_pad, e_pad)

    # VMEM note: gx scratch is seq_len*b_pad*4*hidden*4 B (~64 KiB at these
    # shapes). For long sequences on v7x (64 MiB VMEM) the input projection
    # should be tiled over time blocks instead of kept whole.
    flops = (2 * seq_len * b_pad * e_pad * 4 * hidden                # X @ W_ih^T
             + seq_len * (2 * b_pad * hidden * 4 * hidden            # h @ W_hh^T
                          + 10 * b_pad * hidden))                    # elementwise
    transcendentals = seq_len * b_pad * 5 * hidden
    bytes_accessed = 4 * (seq_len * b_pad * e_pad + e_pad * 4 * hidden
                          + hidden * 4 * hidden + 4 * hidden
                          + b_pad * 2 * hidden)

    hc = pl.pallas_call(
        functools.partial(_lstm_kernel, seq_len, b_pad, hidden),
        out_shape=jax.ShapeDtypeStruct((b_pad, 2 * hidden), jnp.float32),
        scratch_shapes=[
            pltpu.VMEM((seq_len * b_pad, 4 * hidden), jnp.float32),  # gates_x
        ],
        cost_estimate=pl.CostEstimate(flops=flops,
                                      transcendentals=transcendentals,
                                      bytes_accessed=bytes_accessed),
    )(x_p, wih_p, whh_p, bias_p)

    h_n = hc[:batch, :hidden][None]
    c_n = hc[:batch, hidden:][None]
    return h_n, c_n


def encoder_forward(inputs, w_ih, w_hh, b_ih, b_hh):
    """Convenience wrapper (packs on every call). In real use, call
    pack_encoder_params once and reuse encoder_forward_packed."""
    # TODO(synk): optional non-zero initial state_tuple is not plumbed in; the
    # default forward path (zero init) is what this kernel implements.
    packed = pack_encoder_params(w_ih, w_hh, b_ih, b_hh)
    return encoder_forward_packed(inputs, *packed)


def encoder_forward_ref(inputs, w_ih, w_hh, b_ih, b_hh):
    """Pure-JAX reference mirroring torch.nn.LSTM (1 layer, zero init state)."""
    hidden = w_hh.shape[1]

    def step(carry, x_t):
        h, c = carry
        gates = x_t @ w_ih.T + h @ w_hh.T + b_ih + b_hh
        i_g = jax.nn.sigmoid(gates[:, 0 * hidden:1 * hidden])
        f_g = jax.nn.sigmoid(gates[:, 1 * hidden:2 * hidden])
        g_g = jnp.tanh(gates[:, 2 * hidden:3 * hidden])
        o_g = jax.nn.sigmoid(gates[:, 3 * hidden:4 * hidden])
        c_new = f_g * c + i_g * g_g
        h_new = o_g * jnp.tanh(c_new)
        return (h_new, c_new), None

    batch = inputs.shape[1]
    h0 = jnp.zeros((batch, hidden), jnp.float32)
    c0 = jnp.zeros((batch, hidden), jnp.float32)
    (h_n, c_n), _ = jax.lax.scan(step, (h0, c0), inputs)
    return h_n[None], c_n[None]


if __name__ == "__main__":
    # Shapes consistent with module defaults:
    # embedding_dim=7, encoder_h_dim=64, num_layers=1; seq=8, batch=2.
    seq_len, batch, embedding_dim, hidden = 8, 2, 7, 64

    key = jax.random.PRNGKey(0)
    k_x, k_wi, k_wh, k_bi, k_bh = jax.random.split(key, 5)
    bound = 1.0 / jnp.sqrt(hidden)  # PyTorch LSTM default init range

    inputs = jax.random.normal(k_x, (seq_len, batch, embedding_dim), jnp.float32)
    w_ih = jax.random.uniform(k_wi, (4 * hidden, embedding_dim), jnp.float32, -bound, bound)
    w_hh = jax.random.uniform(k_wh, (4 * hidden, hidden), jnp.float32, -bound, bound)
    b_ih = jax.random.uniform(k_bi, (4 * hidden,), jnp.float32, -bound, bound)
    b_hh = jax.random.uniform(k_bh, (4 * hidden,), jnp.float32, -bound, bound)

    # One-time packing (off the hot path), then the jitted forward.
    packed = pack_encoder_params(w_ih, w_hh, b_ih, b_hh)
    h_n, c_n = encoder_forward_packed(inputs, *packed)
    jax.block_until_ready((h_n, c_n))

    h_ref, c_ref = encoder_forward_ref(inputs, w_ih, w_hh, b_ih, b_hh)
    assert h_n.shape == (1, batch, hidden) and c_n.shape == (1, batch, hidden)
    assert jnp.allclose(h_n, h_ref, atol=1e-5, rtol=1e-5)
    assert jnp.allclose(c_n, c_ref, atol=1e-5, rtol=1e-5)

    print("KERNEL_OK")
</pallas_src>

<mosaic_0001>
module attributes {stable_mosaic.version = 11 : i64} {
  func.func @_lstm_kernel(%arg0: memref<64x8xf32, #tpu.memory_space<vmem>>, %arg1: memref<8x256xf32, #tpu.memory_space<vmem>>, %arg2: memref<64x256xf32, #tpu.memory_space<vmem>>, %arg3: memref<1x256xf32, #tpu.memory_space<vmem>>, %arg4: memref<8x128xf32, #tpu.memory_space<vmem>>, %arg5: memref<64x256xf32, #tpu.memory_space<vmem>>) attributes {dimension_semantics = [], scalar_prefetch = 0 : i64, scratch_operands = 1 : i64, tpu.core_type = #tpu.core_type<tc>} {
    %c0 = arith.constant 0 : index
    %c0_0 = arith.constant 0 : index
    %0 = vector.load %arg0[%c0, %c0_0] : memref<64x8xf32, #tpu.memory_space<vmem>>, vector<64x8xf32>
    %c0_1 = arith.constant 0 : index
    %c0_2 = arith.constant 0 : index
    %1 = vector.load %arg1[%c0_1, %c0_2] : memref<8x256xf32, #tpu.memory_space<vmem>>, vector<8x256xf32>
    %cst = arith.constant dense<0.000000e+00> : vector<64x256xf32>
    %2 = tpu.matmul %0, %1, %cst {dimension_numbers = #tpu.dot_dimension_numbers<[1], [0], [0], [1], [0, 0, 1, 1], [], []>} : vector<64x8xf32>, vector<8x256xf32>, vector<64x256xf32> -> vector<64x256xf32>
    %c0_3 = arith.constant 0 : index
    %c0_4 = arith.constant 0 : index
    %3 = vector.load %arg3[%c0_3, %c0_4] : memref<1x256xf32, #tpu.memory_space<vmem>>, vector<1x256xf32>
    %4 = vector.broadcast %3 : vector<1x256xf32> to vector<64x256xf32>
    %5 = arith.addf %2, %4 : vector<64x256xf32>
    %c0_5 = arith.constant 0 : index
    %c0_6 = arith.constant 0 : index
    %6 = vector.load %arg5[%c0_5, %c0_6] : memref<64x256xf32, #tpu.memory_space<vmem>>, vector<64x256xf32>
    tpu.vector_store %arg5[%c0_5, %c0_6], %5 {strides = array<i32>} : memref<64x256xf32, #tpu.memory_space<vmem>>, vector<64x256xf32>,
    %c0_7 = arith.constant 0 : index
    %c0_8 = arith.constant 0 : index
    %7 = vector.load %arg2[%c0_7, %c0_8] : memref<64x256xf32, #tpu.memory_space<vmem>>, vector<64x256xf32>
    %cst_9 = arith.constant 0.000000e+00 : f32
    %8 = vector.broadcast %cst_9 : f32 to vector<8x64xf32>
    %cst_10 = arith.constant 0.000000e+00 : f32
    %9 = vector.broadcast %cst_10 : f32 to vector<8x64xf32>
    %c0_i32 = arith.constant 0 : i32
    %c8_i32 = arith.constant 8 : i32
    %10 = arith.muli %c0_i32, %c8_i32 : i32
    %11 = tpu.assume_multiple %10, 8 : i32
    %12 = arith.index_cast %11 : i32 to index
    %c0_11 = arith.constant 0 : index
    %13 = vector.load %arg5[%12, %c0_11] : memref<64x256xf32, #tpu.memory_space<vmem>>, vector<8x256xf32>
    %cst_12 = arith.constant dense<0.000000e+00> : vector<8x256xf32>
    %14 = tpu.matmul %8, %7, %cst_12 {dimension_numbers = #tpu.dot_dimension_numbers<[1], [0], [0], [1], [0, 0, 1, 1], [], []>} : vector<8x64xf32>, vector<64x256xf32>, vector<8x256xf32> -> vector<8x256xf32>
    %15 = arith.addf %13, %14 : vector<8x256xf32>
    %16 = vector.extract_strided_slice %15 {offsets = [0, 0], sizes = [8, 192], strides = [1, 1]} : vector<8x256xf32> to vector<8x192xf32>
    %17 = arith.negf %16 : vector<8x192xf32>
    %18 = math.exp %17 : vector<8x192xf32>
    %cst_13 = arith.constant 1.000000e+00 : f32
    %19 = vector.broadcast %cst_13 : f32 to vector<8x192xf32>
    %20 = arith.addf %19, %18 : vector<8x192xf32>
    %21 = arith.divf %19, %20 : vector<8x192xf32>
    %22 = vector.extract_strided_slice %15 {offsets = [0, 192], sizes = [8, 64], strides = [1, 1]} : vector<8x256xf32> to vector<8x64xf32>
    %23 = math.tanh %22 : vector<8x64xf32>
    %24 = vector.extract_strided_slice %21 {offsets = [0, 0], sizes = [8, 64], strides = [1, 1]} : vector<8x192xf32> to vector<8x64xf32>
    %25 = vector.extract_strided_slice %21 {offsets = [0, 64], sizes = [8, 64], strides = [1, 1]} : vector<8x192xf32> to vector<8x64xf32>
    %26 = vector.extract_strided_slice %21 {offsets = [0, 128], sizes = [8, 64], strides = [1, 1]} : vector<8x192xf32> to vector<8x64xf32>
    %27 = arith.mulf %25, %9 : vector<8x64xf32>
    %28 = arith.mulf %24, %23 : vector<8x64xf32>
    %29 = arith.addf %27, %28 : vector<8x64xf32>
    %30 = math.tanh %29 : vector<8x64xf32>
    %31 = arith.mulf %26, %30 : vector<8x64xf32>
    %c1_i32 = arith.constant 1 : i32
    %c8_i32_14 = arith.constant 8 : i32
    %32 = arith.muli %c1_i32, %c8_i32_14 : i32
    %33 = tpu.assume_multiple %32, 8 : i32
    %34 = arith.index_cast %33 : i32 to index
    %c0_15 = arith.constant 0 : index
    %35 = vector.load %arg5[%34, %c0_15] : memref<64x256xf32, #tpu.memory_space<vmem>>, vector<8x256xf32>
    %cst_16 = arith.constant dense<0.000000e+00> : vector<8x256xf32>
    %36 = tpu.matmul %31, %7, %cst_16 {dimension_numbers = #tpu.dot_dimension_numbers<[1], [0], [0], [1], [0, 0, 1, 1], [], []>} : vector<8x64xf32>, vector<64x256xf32>, vector<8x256xf32> -> vector<8x256xf32>
    %37 = arith.addf %35, %36 : vector<8x256xf32>
    %38 = vector.extract_strided_slice %37 {offsets = [0, 0], sizes = [8, 192], strides = [1, 1]} : vector<8x256xf32> to vector<8x192xf32>
    %39 = arith.negf %38 : vector<8x192xf32>
    %40 = math.exp %39 : vector<8x192xf32>
    %cst_17 = arith.constant 1.000000e+00 : f32
    %41 = vector.broadcast %cst_17 : f32 to vector<8x192xf32>
    %42 = arith.addf %41, %40 : vector<8x192xf32>
    %43 = arith.divf %41, %42 : vector<8x192xf32>
    %44 = vector.extract_strided_slice %37 {offsets = [0, 192], sizes = [8, 64], strides = [1, 1]} : vector<8x256xf32> to vector<8x64xf32>
    %45 = math.tanh %44 : vector<8x64xf32>
    %46 = vector.extract_strided_slice %43 {offsets = [0, 0], sizes = [8, 64], strides = [1, 1]} : vector<8x192xf32> to vector<8x64xf32>
    %47 = vector.extract_strided_slice %43 {offsets = [0, 64], sizes = [8, 64], strides = [1, 1]} : vector<8x192xf32> to vector<8x64xf32>
    %48 = vector.extract_strided_slice %43 {offsets = [0, 128], sizes = [8, 64], strides = [1, 1]} : vector<8x192xf32> to vector<8x64xf32>
    %49 = arith.mulf %47, %29 : vector<8x64xf32>
    %50 = arith.mulf %46, %45 : vector<8x64xf32>
    %51 = arith.addf %49, %50 : vector<8x64xf32>
    %52 = math.tanh %51 : vector<8x64xf32>
    %53 = arith.mulf %48, %52 : vector<8x64xf32>
    %c2_i32 = arith.constant 2 : i32
    %c8_i32_18 = arith.constant 8 : i32
    %54 = arith.muli %c2_i32, %c8_i32_18 : i32
    %55 = tpu.assume_multiple %54, 8 : i32
    %56 = arith.index_cast %55 : i32 to index
    %c0_19 = arith.constant 0 : index
    %57 = vector.load %arg5[%56, %c0_19] : memref<64x256xf32, #tpu.memory_space<vmem>>, vector<8x256xf32>
    %cst_20 = arith.constant dense<0.000000e+00> : vector<8x256xf32>
    %58 = tpu.matmul %53, %7, %cst_20 {dimension_numbers = #tpu.dot_dimension_numbers<[1], [0], [0], [1], [0, 0, 1, 1], [], []>} : vector<8x64xf32>, vector<64x256xf32>, vector<8x256xf32> -> vector<8x256xf32>
    %59 = arith.addf %57, %58 : vector<8x256xf32>
    %60 = vector.extract_strided_slice %59 {offsets = [0, 0], sizes = [8, 192], strides = [1, 1]} : vector<8x256xf32> to vector<8x192xf32>
    %61 = arith.negf %60 : vector<8x192xf32>
    %62 = math.exp %61 : vector<8x192xf32>
    %cst_21 = arith.constant 1.000000e+00 : f32
    %63 = vector.broadcast %cst_21 : f32 to vector<8x192xf32>
    %64 = arith.addf %63, %62 : vector<8x192xf32>
    %65 = arith.divf %63, %64 : vector<8x192xf32>
    %66 = vector.extract_strided_slice %59 {offsets = [0, 192], sizes = [8, 64], strides = [1, 1]} : vector<8x256xf32> to vector<8x64xf32>
    %67 = math.tanh %66 : vector<8x64xf32>
    %68 = vector.extract_strided_slice %65 {offsets = [0, 0], sizes = [8, 64], strides = [1, 1]} : vector<8x192xf32> to vector<8x64xf32>
    %69 = vector.extract_strided_slice %65 {offsets = [0, 64], sizes = [8, 64], strides = [1, 1]} : vector<8x192xf32> to vector<8x64xf32>
    %70 = vector.extract_strided_slice %65 {offsets = [0, 128], sizes = [8, 64], strides = [1, 1]} : vector<8x192xf32> to vector<8x64xf32>
    %71 = arith.mulf %69, %51 : vector<8x64xf32>
    %72 = arith.mulf %68, %67 : vector<8x64xf32>
    %73 = arith.addf %71, %72 : vector<8x64xf32>
    %74 = math.tanh %73 : vector<8x64xf32>
    %75 = arith.mulf %70, %74 : vector<8x64xf32>
    %c3_i32 = arith.constant 3 : i32
    %c8_i32_22 = arith.constant 8 : i32
    %76 = arith.muli %c3_i32, %c8_i32_22 : i32
    %77 = tpu.assume_multiple %76, 8 : i32
    %78 = arith.index_cast %77 : i32 to index
    %c0_23 = arith.constant 0 : index
    %79 = vector.load %arg5[%78, %c0_23] : memref<64x256xf32, #tpu.memory_space<vmem>>, vector<8x256xf32>
    %cst_24 = arith.constant dense<0.000000e+00> : vector<8x256xf32>
    %80 = tpu.matmul %75, %7, %cst_24 {dimension_numbers = #tpu.dot_dimension_numbers<[1], [0], [0], [1], [0, 0, 1, 1], [], []>} : vector<8x64xf32>, vector<64x256xf32>, vector<8x256xf32> -> vector<8x256xf32>
    %81 = arith.addf %79, %80 : vector<8x256xf32>
    %82 = vector.extract_strided_slice %81 {offsets = [0, 0], sizes = [8, 192], strides = [1, 1]} : vector<8x256xf32> to vector<8x192xf32>
    %83 = arith.negf %82 : vector<8x192xf32>
    %84 = math.exp %83 : vector<8x192xf32>
    %cst_25 = arith.constant 1.000000e+00 : f32
    %85 = vector.broadcast %cst_25 : f32 to vector<8x192xf32>
    %86 = arith.addf %85, %84 : vector<8x192xf32>
    %87 = arith.divf %85, %86 : vector<8x192xf32>
    %88 = vector.extract_strided_slice %81 {offsets = [0, 192], sizes = [8, 64], strides = [1, 1]} : vector<8x256xf32> to vector<8x64xf32>
    %89 = math.tanh %88 : vector<8x64xf32>
    %90 = vector.extract_strided_slice %87 {offsets = [0, 0], sizes = [8, 64], strides = [1, 1]} : vector<8x192xf32> to vector<8x64xf32>
    %91 = vector.extract_strided_slice %87 {offsets = [0, 64], sizes = [8, 64], strides = [1, 1]} : vector<8x192xf32> to vector<8x64xf32>
    %92 = vector.extract_strided_slice %87 {offsets = [0, 128], sizes = [8, 64], strides = [1, 1]} : vector<8x192xf32> to vector<8x64xf32>
    %93 = arith.mulf %91, %73 : vector<8x64xf32>
    %94 = arith.mulf %90, %89 : vector<8x64xf32>
    %95 = arith.addf %93, %94 : vector<8x64xf32>
    %96 = math.tanh %95 : vector<8x64xf32>
    %97 = arith.mulf %92, %96 : vector<8x64xf32>
    %c4_i32 = arith.constant 4 : i32
    %c8_i32_26 = arith.constant 8 : i32
    %98 = arith.muli %c4_i32, %c8_i32_26 : i32
    %99 = tpu.assume_multiple %98, 8 : i32
    %100 = arith.index_cast %99 : i32 to index
    %c0_27 = arith.constant 0 : index
    %101 = vector.load %arg5[%100, %c0_27] : memref<64x256xf32, #tpu.memory_space<vmem>>, vector<8x256xf32>
    %cst_28 = arith.constant dense<0.000000e+00> : vector<8x256xf32>
    %102 = tpu.matmul %97, %7, %cst_28 {dimension_numbers = #tpu.dot_dimension_numbers<[1], [0], [0], [1], [0, 0, 1, 1], [], []>} : vector<8x64xf32>, vector<64x256xf32>, vector<8x256xf32> -> vector<8x256xf32>
    %103 = arith.addf %101, %102 : vector<8x256xf32>
    %104 = vector.extract_strided_slice %103 {offsets = [0, 0], sizes = [8, 192], strides = [1, 1]} : vector<8x256xf32> to vector<8x192xf32>
    %105 = arith.negf %104 : vector<8x192xf32>
    %106 = math.exp %105 : vector<8x192xf32>
    %cst_29 = arith.constant 1.000000e+00 : f32
    %107 = vector.broadcast %cst_29 : f32 to vector<8x192xf32>
    %108 = arith.addf %107, %106 : vector<8x192xf32>
    %109 = arith.divf %107, %108 : vector<8x192xf32>
    %110 = vector.extract_strided_slice %103 {offsets = [0, 192], sizes = [8, 64], strides = [1, 1]} : vector<8x256xf32> to vector<8x64xf32>
    %111 = math.tanh %110 : vector<8x64xf32>
    %112 = vector.extract_strided_slice %109 {offsets = [0, 0], sizes = [8, 64], strides = [1, 1]} : vector<8x192xf32> to vector<8x64xf32>
    %113 = vector.extract_strided_slice %109 {offsets = [0, 64], sizes = [8, 64], strides = [1, 1]} : vector<8x192xf32> to vector<8x64xf32>
    %114 = vector.extract_strided_slice %109 {offsets = [0, 128], sizes = [8, 64], strides = [1, 1]} : vector<8x192xf32> to vector<8x64xf32>
    %115 = arith.mulf %113, %95 : vector<8x64xf32>
    %116 = arith.mulf %112, %111 : vector<8x64xf32>
    %117 = arith.addf %115, %116 : vector<8x64xf32>
    %118 = math.tanh %117 : vector<8x64xf32>
    %119 = arith.mulf %114, %118 : vector<8x64xf32>
    %c5_i32 = arith.constant 5 : i32
    %c8_i32_30 = arith.constant 8 : i32
    %120 = arith.muli %c5_i32, %c8_i32_30 : i32
    %121 = tpu.assume_multiple %120, 8 : i32
    %122 = arith.index_cast %121 : i32 to index
    %c0_31 = arith.constant 0 : index
    %123 = vector.load %arg5[%122, %c0_31] : memref<64x256xf32, #tpu.memory_space<vmem>>, vector<8x256xf32>
    %cst_32 = arith.constant dense<0.000000e+00> : vector<8x256xf32>
    %124 = tpu.matmul %119, %7, %cst_32 {dimension_numbers = #tpu.dot_dimension_numbers<[1], [0], [0], [1], [0, 0, 1, 1], [], []>} : vector<8x64xf32>, vector<64x256xf32>, vector<8x256xf32> -> vector<8x256xf32>
    %125 = arith.addf %123, %124 : vector<8x256xf32>
    %126 = vector.extract_strided_slice %125 {offsets = [0, 0], sizes = [8, 192], strides = [1, 1]} : vector<8x256xf32> to vector<8x192xf32>
    %127 = arith.negf %126 : vector<8x192xf32>
    %128 = math.exp %127 : vector<8x192xf32>
    %cst_33 = arith.constant 1.000000e+00 : f32
    %129 = vector.broadcast %cst_33 : f32 to vector<8x192xf32>
    %130 = arith.addf %129, %128 : vector<8x192xf32>
    %131 = arith.divf %129, %130 : vector<8x192xf32>
    %132 = vector.extract_strided_slice %125 {offsets = [0, 192], sizes = [8, 64], strides = [1, 1]} : vector<8x256xf32> to vector<8x64xf32>
    %133 = math.tanh %132 : vector<8x64xf32>
    %134 = vector.extract_strided_slice %131 {offsets = [0, 0], sizes = [8, 64], strides = [1, 1]} : vector<8x192xf32> to vector<8x64xf32>
    %135 = vector.extract_strided_slice %131 {offsets = [0, 64], sizes = [8, 64], strides = [1, 1]} : vector<8x192xf32> to vector<8x64xf32>
    %136 = vector.extract_strided_slice %131 {offsets = [0, 128], sizes = [8, 64], strides = [1, 1]} : vector<8x192xf32> to vector<8x64xf32>
    %137 = arith.mulf %135, %117 : vector<8x64xf32>
    %138 = arith.mulf %134, %133 : vector<8x64xf32>
    %139 = arith.addf %137, %138 : vector<8x64xf32>
    %140 = math.tanh %139 : vector<8x64xf32>
    %141 = arith.mulf %136, %140 : vector<8x64xf32>
    %c6_i32 = arith.constant 6 : i32
    %c8_i32_34 = arith.constant 8 : i32
    %142 = arith.muli %c6_i32, %c8_i32_34 : i32
    %143 = tpu.assume_multiple %142, 8 : i32
    %144 = arith.index_cast %143 : i32 to index
    %c0_35 = arith.constant 0 : index
    %145 = vector.load %arg5[%144, %c0_35] : memref<64x256xf32, #tpu.memory_space<vmem>>, vector<8x256xf32>
    %cst_36 = arith.constant dense<0.000000e+00> : vector<8x256xf32>
    %146 = tpu.matmul %141, %7, %cst_36 {dimension_numbers = #tpu.dot_dimension_numbers<[1], [0], [0], [1], [0, 0, 1, 1], [], []>} : vector<8x64xf32>, vector<64x256xf32>, vector<8x256xf32> -> vector<8x256xf32>
    %147 = arith.addf %145, %146 : vector<8x256xf32>
    %148 = vector.extract_strided_slice %147 {offsets = [0, 0], sizes = [8, 192], strides = [1, 1]} : vector<8x256xf32> to vector<8x192xf32>
    %149 = arith.negf %148 : vector<8x192xf32>
    %150 = math.exp %149 : vector<8x192xf32>
    %cst_37 = arith.constant 1.000000e+00 : f32
    %151 = vector.broadcast %cst_37 : f32 to vector<8x192xf32>
    %152 = arith.addf %151, %150 : vector<8x192xf32>
    %153 = arith.divf %151, %152 : vector<8x192xf32>
    %154 = vector.extract_strided_slice %147 {offsets = [0, 192], sizes = [8, 64], strides = [1, 1]} : vector<8x256xf32> to vector<8x64xf32>
    %155 = math.tanh %154 : vector<8x64xf32>
    %156 = vector.extract_strided_slice %153 {offsets = [0, 0], sizes = [8, 64], strides = [1, 1]} : vector<8x192xf32> to vector<8x64xf32>
    %157 = vector.extract_strided_slice %153 {offsets = [0, 64], sizes = [8, 64], strides = [1, 1]} : vector<8x192xf32> to vector<8x64xf32>
    %158 = vector.extract_strided_slice %153 {offsets = [0, 128], sizes = [8, 64], strides = [1, 1]} : vector<8x192xf32> to vector<8x64xf32>
    %159 = arith.mulf %157, %139 : vector<8x64xf32>
    %160 = arith.mulf %156, %155 : vector<8x64xf32>
    %161 = arith.addf %159, %160 : vector<8x64xf32>
    %162 = math.tanh %161 : vector<8x64xf32>
    %163 = arith.mulf %158, %162 : vector<8x64xf32>
    %c7_i32 = arith.constant 7 : i32
    %c8_i32_38 = arith.constant 8 : i32
    %164 = arith.muli %c7_i32, %c8_i32_38 : i32
    %165 = tpu.assume_multiple %164, 8 : i32
    %166 = arith.index_cast %165 : i32 to index
    %c0_39 = arith.constant 0 : index
    %167 = vector.load %arg5[%166, %c0_39] : memref<64x256xf32, #tpu.memory_space<vmem>>, vector<8x256xf32>
    %cst_40 = arith.constant dense<0.000000e+00> : vector<8x256xf32>
    %168 = tpu.matmul %163, %7, %cst_40 {dimension_numbers = #tpu.dot_dimension_numbers<[1], [0], [0], [1], [0, 0, 1, 1], [], []>} : vector<8x64xf32>, vector<64x256xf32>, vector<8x256xf32> -> vector<8x256xf32>
    %169 = arith.addf %167, %168 : vector<8x256xf32>
    %170 = vector.extract_strided_slice %169 {offsets = [0, 0], sizes = [8, 192], strides = [1, 1]} : vector<8x256xf32> to vector<8x192xf32>
    %171 = arith.negf %170 : vector<8x192xf32>
    %172 = math.exp %171 : vector<8x192xf32>
    %cst_41 = arith.constant 1.000000e+00 : f32
    %173 = vector.broadcast %cst_41 : f32 to vector<8x192xf32>
    %174 = arith.addf %173, %172 : vector<8x192xf32>
    %175 = arith.divf %173, %174 : vector<8x192xf32>
    %176 = vector.extract_strided_slice %169 {offsets = [0, 192], sizes = [8, 64], strides = [1, 1]} : vector<8x256xf32> to vector<8x64xf32>
    %177 = math.tanh %176 : vector<8x64xf32>
    %178 = vector.extract_strided_slice %175 {offsets = [0, 0], sizes = [8, 64], strides = [1, 1]} : vector<8x192xf32> to vector<8x64xf32>
    %179 = vector.extract_strided_slice %175 {offsets = [0, 64], sizes = [8, 64], strides = [1, 1]} : vector<8x192xf32> to vector<8x64xf32>
    %180 = vector.extract_strided_slice %175 {offsets = [0, 128], sizes = [8, 64], strides = [1, 1]} : vector<8x192xf32> to vector<8x64xf32>
    %181 = arith.mulf %179, %161 : vector<8x64xf32>
    %182 = arith.mulf %178, %177 : vector<8x64xf32>
    %183 = arith.addf %181, %182 : vector<8x64xf32>
    %184 = math.tanh %183 : vector<8x64xf32>
    %185 = arith.mulf %180, %184 : vector<8x64xf32>
    %c8_i32_42 = arith.constant 8 : i32
    %186 = tpu.concatenate %185, %183 in 1 : vector<8x64xf32>, vector<8x64xf32> -> vector<8x128xf32>
    %c0_43 = arith.constant 0 : index
    %c0_44 = arith.constant 0 : index
    %187 = vector.load %arg4[%c0_43, %c0_44] : memref<8x128xf32, #tpu.memory_space<vmem>>, vector<8x128xf32>
    tpu.vector_store %arg4[%c0_43, %c0_44], %186 {strides = array<i32>} : memref<8x128xf32, #tpu.memory_space<vmem>>, vector<8x128xf32>,
    return
  }
}

</mosaic_0001>

<bundles_post_ra>
// kernel: encoder_forward_packed.1
= control target key start
LH: loop header
LB: loop body
LE: loop exit
PB: predicated region body
PF: predicated region fallthrough
CT: control target
= control target key end

     0   :  { %9 = vsyncpa [#allocation4], 0  ;;  %s1442_s15 = smov [#allocation3]   ;;  %s1707_s0 = inlined_call_operand.vmem [shape: f32[64,8], index: 0, kind: input, shape index: {}]   ;;  %s1708_s1 = inlined_call_operand.vmem [shape: f32[8,256], index: 1, kind: input, shape index: {}]   ;;  %s1709_s2 = inlined_call_operand.hbm [shape: f32[64,256], index: 2, kind: input, shape index: {}]   ;;  %s1710_s3 = inlined_call_operand.vmem [shape: f32[1,256], index: 3, kind: input, shape index: {}]   ;;  %s1711_s4 = inlined_call_operand.vmem [shape: f32[8,128], index: 4, kind: output, shape index: {}]  }
   0x1   :  { %s19_s16 = sshll.u32 %s1442_s15, 4  ;;  %s1418_s19 = scalar_lea.hbm %s1709_s2, 2048  ;;  %s20_s16 = int_to_ptr.vmem [resolvable:$true] %s19_s16 }
   0x2   :  { %p1419_p0 = scmp.ne.s32.totalorder %s1709_s2, %s1418_s19  ;;  %p1422_p1 = scmp.lt.u32.totalorder %s1418_s19, %s1709_s2 }
   0x4   :  { %p1424_p2 = pnand %p1422_p1, %p1419_p0 }
   0x6   :  { %1427 = shalt.err (!%p1424_p2)
}
   0x7   :  { %s1428_s24 = scalar_lea.vmem %s20_s16, 2048  ;;  %p1433_p4 = scmp.lt.s32.totalorder %s20_s16, %s20_s16 }
   0x8   :  { %p1429_p3 = scmp.ne.s32.totalorder %s20_s16, %s1428_s24  ;;  %p1434_p5 = scmp.lt.s32.totalorder %s1428_s24, %s1428_s24 }
   0xa   :  { %p1435_p6 = por %p1434_p5, %p1433_p4 }
   0xc   :  { %p1436_p7 = pnand %p1435_p6, %p1429_p3 }
   0xe   :  { %1439 = shalt.err (!%p1436_p7)
}
   0xf   :  { %s1443_s25 = smov 256   ;;  %s1444_s26 = smov 16  }
  0x10   :  { %25 = dma.hbm_to_vmem [thread:$0]  %s1709_s2, 2048, %s20_s16, [#allocation4], %s1443_s25, %s1443_s25, %s1444_s26  }
  0x11   :  { %1440 = dma.done.wait [#allocation4], 2048  }
  0x12   :  { %1441 = vsyncadd [#allocation4], 4294965248  ;;  %v1445_v0 = vmov 0.0   ;;  %v40_v1 = vld [vmem:[%s1708_s1 + $0x8] sm:$0xff]  ;;  %v39_v2 = vld [vmem:[%s1708_s1] sm:$0xff]  ;;  %vm53_vm0 = vcmask 64512   ;;  %v43_v39 = vlaneseq }
  0x13   :  { %142 = vmatprep.mubr.f32.mxu1 %v1445_v0  ;;  %629 = vmatprep.mubr.f32.mxu0 %v1445_v0  ;;  %v31_v3 = vld [vmem:[%s1707_s0] sm:$0xff]  ;;  %v208_v4 = vld [vmem:[#allocation3 + $0x8] sm:$0xff]  ;;  %v210_v5 = vld [vmem:[#allocation3 + $0x18] sm:$0xff]  ;;  %s1446_s22 = smov 64   ;;  %vm228_vm1 = vcmask 523264  }
  0x14   :  { %78 = vmatprep.subr.mxu1 %v40_v1  ;;  %v207_v6 = vld [vmem:[#allocation3] sm:$0xff]  ;;  %v1495_v7 = vpack.c.bf16 %v210_v5, %v208_v4  ;;  %v209_v8 = vld [vmem:[#allocation3 + $0x10] sm:$0xff]  ;;  %v212_v10 = vld [vmem:[#allocation3 + $0x28] sm:$0xff]  ;;  %v44_v42 = vshrl.u32 %v43_v39, 7 }
  0x15   :  { %79 = vmatpush1.msra.mxu1 %v39_v2  ;;  %v1498_v9 = vpack.c.bf16 %v209_v8, %v207_v6  ;;  %v214_v11 = vld [vmem:[#allocation3 + $0x38] sm:$0xff]  ;;  %v211_v12 = vld [vmem:[#allocation3 + $0x20] sm:$0xff]  ;;  %v32_v13 = vld [vmem:[%s1707_s0 + $0x8] sm:$0xff] }
  0x16   :  { %1126 = vmatmul.mubr.msk.f32.vlgmr.msra.gmra.mrb[0].mxu1 %vm53_vm0, %v31_v3  ;;  %1158 = vmatprep.subr.bf16.mxu1 %v1495_v7  ;;  %v1505_v14 = vpack.c.bf16 %v214_v11, %v212_v10  ;;  %v213_v15 = vld [vmem:[#allocation3 + $0x30] sm:$0xff]  ;;  %v216_v17 = vld [vmem:[#allocation3 + $0x48] sm:$0xff]  ;;  %v218_v18 = vld [vmem:[#allocation3 + $0x58] sm:$0xff]  ;;  %v49_v45 = vsub.s32 1, %v44_v42  ;;  %v45_v54 = vsub.s32 0, %v44_v42 }
  0x17   :  { %148 = vmatprep.mubr.f32.mxu1 %v1445_v0  ;;  %1160 = vmatpush1.bf16.msra.mxu1 %v1498_v9  ;;  %v1508_v16 = vpack.c.bf16 %v213_v15, %v211_v12  ;;  %v1512_v19 = vpack.c.bf16 %v218_v18, %v216_v17  ;;  %v215_v20 = vld [vmem:[#allocation3 + $0x40] sm:$0xff]  ;;  %v217_v21 = vld [vmem:[#allocation3 + $0x50] sm:$0xff]  ;;  %v220_v22 = vld [vmem:[#allocation3 + $0x68] sm:$0xff] }
  0x18   :  { %1206 = vmatprep.subr.bf16.mxu0 %v1495_v7  ;;  %1162 = vmatprep.subr.bf16.mxu1 %v1505_v14  ;;  %v222_v23 = vld [vmem:[#allocation3 + $0x78] sm:$0xff]  ;;  %v33_v24 = vld [vmem:[%s1707_s0 + $0x10] sm:$0xff]  ;;  %v1522_v25 = vpack.c.bf16 %v217_v21, %v215_v20  ;;  %v219_v27 = vld [vmem:[#allocation3 + $0x60] sm:$0xff] }
  0x19   :  { %1208 = vmatpush1.bf16.msra.mxu0 %v1498_v9  ;;  %v1525_v26 = vpack.c.bf16 %v222_v23, %v220_v22  ;;  %v221_v28 = vld [vmem:[#allocation3 + $0x70] sm:$0xff]  ;;  %v34_v29 = vld [vmem:[%s1707_s0 + $0x18] sm:$0xff]  ;;  %v35_v31 = vld [vmem:[%s1707_s0 + $0x20] sm:$0xff] }
  0x1a   :  { %1127 = vmatmul.mubr.msk.f32.gmra.mrb[2].mxu1 %vm53_vm0, %v32_v13  ;;  %1210 = vmatprep.subr.bf16.mxu0 %v1505_v14  ;;  %v1535_v30 = vpack.c.bf16 %v221_v28, %v219_v27  ;;  %v36_v32 = vld [vmem:[%s1707_s0 + $0x28] sm:$0xff]  ;;  %v37_v33 = vld [vmem:[%s1707_s0 + $0x30] sm:$0xff]  ;;  %v38_v34 = vld [vmem:[%s1707_s0 + $0x38] sm:$0xff] }
  0x1b   :  { %154 = vmatprep.mubr.f32.mxu1 %v1445_v0  ;;  %1164 = vmatpush1.bf16.msra.mxu1 %v1508_v16  ;;  %v41_v47 = vld [vmem:[%s1710_s3] sm:$0x3] }
  0x1c   :  { %1166 = vmatprep.subr.bf16.mxu1 %v1512_v19  ;;  %v1599_v49 = vrot.slane %v41_v47, %v49_v45  ;;  %v1603_v55 = vrot.slane %v41_v47, %v45_v54 }
  0x1d   :  { %1212 = vmatpush1.bf16.msra.mxu0 %v1508_v16 }
  0x1e   :  { %1128 = vmatmul.mubr.msk.f32.gmra.mrb[4].mxu1 %vm53_vm0, %v33_v24  ;;  %1214 = vmatprep.subr.bf16.mxu0 %v1512_v19 }
  0x1f   :  { %160 = vmatprep.mubr.f32.mxu1 %v1445_v0  ;;  %1168 = vmatpush1.bf16.msra.mxu1 %v1522_v25 }
  0x20   :  { %1170 = vmatprep.subr.bf16.mxu1 %v1525_v26 }
  0x21   :  { %1216 = vmatpush1.bf16.msra.mxu0 %v1522_v25 }
  0x22   :  { %1129 = vmatmul.mubr.msk.f32.gmra.mrb[6].mxu1 %vm53_vm0, %v34_v29  ;;  %1218 = vmatprep.subr.bf16.mxu0 %v1525_v26 }
  0x23   :  { %166 = vmatprep.mubr.f32.mxu1 %v1445_v0  ;;  %1172 = vmatpush1.bf16.msra.mxu1 %v1535_v30 }
  0x24   :  { %1174 = vmatprep.subr.bf16.mxu1 %v1495_v7 }
  0x25   :  { %1220 = vmatpush1.bf16.msra.mxu0 %v1535_v30 }
  0x26   :  { %1130 = vmatmul.mubr.msk.f32.gmra.mrb[8].mxu1 %vm53_vm0, %v35_v31  ;;  %1222 = vmatprep.subr.bf16.mxu0 %v1495_v7 }
  0x27   :  { %172 = vmatprep.mubr.f32.mxu1 %v1445_v0 }
  0x2a   :  { %1131 = vmatmul.mubr.msk.f32.gmra.mrb[10].mxu1 %vm53_vm0, %v36_v32 }
  0x2b   :  { %178 = vmatprep.mubr.f32.mxu1 %v1445_v0 }
  0x2e   :  { %1132 = vmatmul.mubr.msk.f32.gmra.mrb[12].mxu1 %vm53_vm0, %v37_v33 }
  0x2f   :  { %184 = vmatprep.mubr.f32.mxu1 %v1445_v0 }
  0x32   :  { %1133 = vmatmul.mubr.msk.f32.gmra.mrb[14].mxu1 %vm53_vm0, %v38_v34 }
  0x33   :  { %296 = vmatprep.mubr.f32.mxu1 %v1445_v0 }
  0x36   :  { %297 = vmatmul.mubr.f32.vlgmr.msra.gmra.mrb[0].mxu1 %v1445_v0 }
  0x37   :  { %1176 = vmatpush1.bf16.msra.mxu1 %v1498_v9  ;;  %407 = vmatprep.mubr.f32.mxu1 %v1445_v0 }
  0x38   :  { %1178 = vmatprep.subr.bf16.mxu1 %v1505_v14 }
  0x3b   :  { %1180 = vmatpush1.bf16.msra.mxu1 %v1508_v16 }
  0x3c   :  { %1182 = vmatprep.subr.bf16.mxu1 %v1512_v19 }
  0x3f   :  { %1184 = vmatpush1.bf16.msra.mxu1 %v1522_v25 }
  0x40   :  { %1186 = vmatprep.subr.bf16.mxu1 %v1525_v26 }
  0x43   :  { %1188 = vmatpush1.bf16.msra.mxu1 %v1535_v30 }
  0x44   :  { %1190 = vmatprep.subr.bf16.mxu1 %v1495_v7 }
  0xf5   :  { %v1576_v35 = vpop.f32.mrb[6].mxu1 }
  0xf6   :  { %v1578_v36 = vpop.f32.mrb[7].mxu1 }
  0xf9   :  { %v1580_v37 = vpop.f32.mrb[8].mxu1 }
  0xfa   :  { %v1582_v38 = vpop.f32.mrb[9].mxu1 }
  0xfd   :  { %v1584_v40 = vpop.f32.mrb[10].mxu1 }
  0xfe   :  { %v1586_v41 = vpop.f32.mrb[11].mxu1 }
 0x101   :  { %v1588_v43 = vpop.f32.mrb[12].mxu1 }
 0x102   :  { %v1590_v44 = vpop.f32.mrb[13].mxu1 }
 0x105   :  { %v1592_v46 = vpop.f32.mrb[14].mxu1 }
 0x106   :  { %v1597_v48 = vpop.f32.mrb[15].mxu1 }
 0x109   :  { %v298_v50 = vpop.f32.mrb[0].mxu1 }
 0x10a   :  { %v300_v51 = vpop.f32.mrb[1].mxu1  ;;  %v1285_v56 = vadd.f32 %v298_v50, %v1603_v55 }
 0x10b   :  { %v1286_v52 = vadd.f32 %v300_v51, %v1599_v49 }
 0x10c   :  { %v1134_v57 = vmul.f32 -1.442695, %v1285_v56 }
 0x10d   :  { %1322 = vtanh.f32 %v1286_v52  ;;  %v1135_v4 = vmul.f32 -1.442695, %v1286_v52 }
 0x10e   :  { %1324 = vpow2.f32 %v1134_v57 }
 0x117   :  { %v1323_v53 = vpop.eup %1322 }
 0x118   :  { %320 = vrot.lane.b32.xlu0 %v1323_v53, %s1446_s22  ;;  %v1325_v58 = vpop.eup %1324 }
 0x119   :  { %v311_v59 = vadd.f32 1.0, %v1325_v58 }
 0x11b   :  { %1326 = vrcp.f32 %v311_v59 }
 0x125   :  { %v1327_v60 = vpop.eup %1326 }
 0x126   :  { %v318_v63 = vmul.f32 0.0, %v1327_v60 }
 0x18a   :  { %v321_v61 = vpop.permute.xlu0 %320 }
 0x18b   :  { %v323_v62 = vmul.f32 %v1327_v60, %v321_v61 }
 0x18d   :  { %325 = vrot.lane.b32.xlu0 %v323_v62, %s1446_s22 }
 0x1ff   :  { %v326_v1 = vpop.permute.xlu0 %325 }
 0x200   :  { %v328_v2 = vadd.f32 %v326_v1, %v318_v63 }
 0x202   :  { %1328 = vtanh.f32 %v328_v2 }
 0x203   :  { %1330 = vpow2.f32 %v1135_v4 }
 0x20c   :  { %v1329_v3 = vpop.eup %1328 }
 0x20d   :  { %331 = vrot.lane.b32.xlu1 %v1329_v3, %s1446_s22  ;;  %v1331_v5 = vpop.eup %1330 }
 0x20e   :  { %v312_v6 = vadd.f32 1.0, %v1331_v5 }
 0x210   :  { %1332 = vrcp.f32 %v312_v6 }
 0x21a   :  { %v1333_v8 = vpop.eup %1332 }
 0x27f   :  { %v332_v10 = vpop.permute.xlu1 %331 }
 0x280   :  { %v334_v11 = vmul.f32 %v1333_v8, %v332_v10 }
 0x282   :  { %1136 = vmatmul.mubr.msk.f32.vlgmr.msra.gmra.mrb[2].mxu1 %vm228_vm1, %v334_v11  ;;  %v163_v11 = vadd.f32 %v1576_v35, %v1603_v55 }
 0x283   :  { %1192 = vmatpush1.bf16.msra.mxu1 %v1498_v9  ;;  %518 = vmatprep.mubr.f32.mxu1 %v1445_v0 }
 0x284   :  { %1194 = vmatprep.subr.bf16.mxu1 %v1505_v14 }
 0x287   :  { %1196 = vmatpush1.bf16.msra.mxu1 %v1508_v16 }
 0x288   :  { %1198 = vmatprep.subr.bf16.mxu1 %v1512_v19 }
 0x28b   :  { %1200 = vmatpush1.bf16.msra.mxu1 %v1522_v25 }
 0x28c   :  { %1202 = vmatprep.subr.bf16.mxu1 %v1525_v26 }
 0x28f   :  { %1204 = vmatpush1.bf16.msra.mxu1 %v1535_v30 }
 0x355   :  { %v409_v12 = vpop.f32.mrb[2].mxu1 }
 0x356   :  { %v411_v13 = vpop.f32.mrb[3].mxu1  ;;  %v1287_v18 = vadd.f32 %v409_v12, %v1603_v55  ;;  %v165_v12 = vadd.f32 %v1578_v36, %v1599_v49 }
 0x357   :  { %v1288_v15 = vadd.f32 %v411_v13, %v1599_v49 }
 0x358   :  { %v1137_v20 = vmul.f32 -1.442695, %v1287_v18 }
 0x359   :  { %1334 = vtanh.f32 %v1288_v15  ;;  %v1138_v33 = vmul.f32 -1.442695, %v1288_v15 }
 0x35a   :  { %1336 = vpow2.f32 %v1137_v20 }
 0x363   :  { %v1335_v17 = vpop.eup %1334 }
 0x364   :  { %431 = vrot.lane.b32.xlu1 %v1335_v17, %s1446_s22  ;;  %v1337_v21 = vpop.eup %1336 }
 0x365   :  { %v422_v22 = vadd.f32 1.0, %v1337_v21 }
 0x367   :  { %1338 = vrcp.f32 %v422_v22 }
 0x371   :  { %v1339_v23 = vpop.eup %1338 }
 0x372   :  { %v429_v28 = vmul.f32 %v1339_v23, %v328_v2 }
 0x3d6   :  { %v432_v24 = vpop.permute.xlu1 %431 }
 0x3d7   :  { %v434_v27 = vmul.f32 %v1339_v23, %v432_v24 }
 0x3d9   :  { %436 = vrot.lane.b32.xlu0 %v434_v27, %s1446_s22 }
 0x44b   :  { %v437_v29 = vpop.permute.xlu0 %436 }
 0x44c   :  { %v439_v31 = vadd.f32 %v437_v29, %v429_v28 }
 0x44e   :  { %1340 = vtanh.f32 %v439_v31 }
 0x44f   :  { %1342 = vpow2.f32 %v1138_v33 }
 0x458   :  { %v1341_v32 = vpop.eup %1340 }
 0x459   :  { %442 = vrot.lane.b32.xlu1 %v1341_v32, %s1446_s22  ;;  %v1343_v34 = vpop.eup %1342 }
 0x45a   :  { %v423_v39 = vadd.f32 1.0, %v1343_v34 }
 0x45c   :  { %1344 = vrcp.f32 %v423_v39 }
 0x466   :  { %v1345_v42 = vpop.eup %1344 }
 0x4cb   :  { %v443_v45 = vpop.permute.xlu1 %442 }
 0x4cc   :  { %v445_v47 = vmul.f32 %v1345_v42, %v443_v45 }
 0x4ce   :  { %1139 = vmatmul.mubr.msk.f32.vlgmr.msra.gmra.mrb[4].mxu1 %vm228_vm1, %v445_v47  ;;  %v169_v47 = vadd.f32 %v1580_v37, %v1603_v55 }
 0x5a1   :  { %v520_v50 = vpop.f32.mrb[4].mxu1 }
 0x5a2   :  { %v522_v51 = vpop.f32.mrb[5].mxu1  ;;  %v1289_v54 = vadd.f32 %v520_v50, %v1603_v55  ;;  %v171_v50 = vadd.f32 %v1582_v38, %v1599_v49 }
 0x5a3   :  { %v1290_v52 = vadd.f32 %v522_v51, %v1599_v49 }
 0x5a4   :  { %v1140_v56 = vmul.f32 -1.442695, %v1289_v54 }
 0x5a5   :  { %1346 = vtanh.f32 %v1290_v52  ;;  %v1141_v3 = vmul.f32 -1.442695, %v1290_v52 }
 0x5a6   :  { %1348 = vpow2.f32 %v1140_v56 }
 0x5af   :  { %v1347_v53 = vpop.eup %1346 }
 0x5b0   :  { %542 = vrot.lane.b32.xlu0 %v1347_v53, %s1446_s22  ;;  %v1349_v57 = vpop.eup %1348 }
 0x5b1   :  { %v533_v58 = vadd.f32 1.0, %v1349_v57 }
 0x5b3   :  { %1350 = vrcp.f32 %v533_v58 }
 0x5bd   :  { %v1351_v59 = vpop.eup %1350 }
 0x5be   :  { %v540_v62 = vmul.f32 %v1351_v59, %v439_v31 }
 0x622   :  { %v543_v60 = vpop.permute.xlu0 %542 }
 0x623   :  { %v545_v61 = vmul.f32 %v1351_v59, %v543_v60 }
 0x625   :  { %547 = vrot.lane.b32.xlu1 %v545_v61, %s1446_s22 }
 0x697   :  { %v548_v63 = vpop.permute.xlu1 %547 }
 0x698   :  { %v550_v1 = vadd.f32 %v548_v63, %v540_v62 }
 0x69a   :  { %1352 = vtanh.f32 %v550_v1 }
 0x69b   :  { %1354 = vpow2.f32 %v1141_v3 }
 0x6a4   :  { %v1353_v2 = vpop.eup %1352 }
 0x6a5   :  { %553 = vrot.lane.b32.xlu0 %v1353_v2, %s1446_s22  ;;  %v1355_v4 = vpop.eup %1354 }
 0x6a6   :  { %v534_v5 = vadd.f32 1.0, %v1355_v4 }
 0x6a8   :  { %1356 = vrcp.f32 %v534_v5 }
 0x6b2   :  { %v1357_v6 = vpop.eup %1356 }
 0x717   :  { %v554_v8 = vpop.permute.xlu0 %553 }
 0x718   :  { %v556_v10 = vmul.f32 %v1357_v6, %v554_v8 }
 0x71a   :  { %1142 = vmatmul.mubr.msk.f32.vlgmr.msra.gmra.mrb[0].mxu0 %vm228_vm1, %v556_v10  ;;  %v175_v10 = vadd.f32 %v1584_v40, %v1603_v55 }
 0x71b   :  { %1224 = vmatpush1.bf16.msra.mxu0 %v1498_v9  ;;  %740 = vmatprep.mubr.f32.mxu0 %v1445_v0 }
 0x71c   :  { %1226 = vmatprep.subr.bf16.mxu0 %v1505_v14 }
 0x71f   :  { %1228 = vmatpush1.bf16.msra.mxu0 %v1508_v16 }
 0x720   :  { %1230 = vmatprep.subr.bf16.mxu0 %v1512_v19 }
 0x723   :  { %1232 = vmatpush1.bf16.msra.mxu0 %v1522_v25 }
 0x724   :  { %1234 = vmatprep.subr.bf16.mxu0 %v1525_v26 }
 0x727   :  { %1236 = vmatpush1.bf16.msra.mxu0 %v1535_v30 }
 0x728   :  { %1238 = vmatprep.subr.bf16.mxu0 %v1495_v7 }
 0x7ed   :  { %v631_v13 = vpop.f32.mrb[0].mxu0 }
 0x7ee   :  { %v636_v15 = vadd.f32 %v631_v13, %v163_v11  ;;  %v633_v17 = vpop.f32.mrb[1].mxu0  ;;  %v177_v11 = vadd.f32 %v1586_v41, %v1599_v49 }
 0x7ef   :  { %v637_v18 = vadd.f32 %v633_v17, %v165_v12 }
 0x7f0   :  { %v1143_v21 = vmul.f32 -1.442695, %v636_v15 }
 0x7f1   :  { %1358 = vtanh.f32 %v637_v18  ;;  %v1144_v32 = vmul.f32 -1.442695, %v637_v18 }
 0x7f2   :  { %1360 = vpow2.f32 %v1143_v21 }
 0x7fb   :  { %v1359_v20 = vpop.eup %1358 }
 0x7fc   :  { %653 = vrot.lane.b32.xlu1 %v1359_v20, %s1446_s22  ;;  %v1361_v22 = vpop.eup %1360 }
 0x7fd   :  { %v644_v23 = vadd.f32 1.0, %v1361_v22 }
 0x7ff   :  { %1362 = vrcp.f32 %v644_v23 }
 0x809   :  { %v1363_v24 = vpop.eup %1362 }
 0x80a   :  { %v651_v35 = vmul.f32 %v1363_v24, %v550_v1 }
 0x86e   :  { %v654_v27 = vpop.permute.xlu1 %653 }
 0x86f   :  { %v656_v28 = vmul.f32 %v1363_v24, %v654_v27 }
 0x871   :  { %658 = vrot.lane.b32.xlu0 %v656_v28, %s1446_s22 }
 0x8e3   :  { %v659_v36 = vpop.permute.xlu0 %658 }
 0x8e4   :  { %v661_v29 = vadd.f32 %v659_v36, %v651_v35 }
 0x8e6   :  { %1364 = vtanh.f32 %v661_v29 }
 0x8e7   :  { %1366 = vpow2.f32 %v1144_v32 }
 0x8f0   :  { %v1365_v31 = vpop.eup %1364 }
 0x8f1   :  { %664 = vrot.lane.b32.xlu1 %v1365_v31, %s1446_s22  ;;  %v1367_v33 = vpop.eup %1366 }
 0x8f2   :  { %v645_v34 = vadd.f32 1.0, %v1367_v33 }
 0x8f4   :  { %1368 = vrcp.f32 %v645_v34  ;;  %v181_v34 = vadd.f32 %v1588_v43, %v1603_v55 }
 0x8fe   :  { %v1369_v39 = vpop.eup %1368 }
 0x963   :  { %v665_v42 = vpop.permute.xlu1 %664 }
 0x964   :  { %v667_v45 = vmul.f32 %v1369_v39, %v665_v42 }
 0x966   :  { %1145 = vmatmul.mubr.msk.f32.vlgmr.msra.gmra.mrb[2].mxu0 %vm228_vm1, %v667_v45 }
 0x967   :  { %1240 = vmatpush1.bf16.msra.mxu0 %v1498_v9  ;;  %851 = vmatprep.mubr.f32.mxu0 %v1445_v0 }
 0x968   :  { %1242 = vmatprep.subr.bf16.mxu0 %v1505_v14 }
 0x96b   :  { %1244 = vmatpush1.bf16.msra.mxu0 %v1508_v16 }
 0x96c   :  { %1246 = vmatprep.subr.bf16.mxu0 %v1512_v19 }
 0x96f   :  { %1248 = vmatpush1.bf16.msra.mxu0 %v1522_v25 }
 0x970   :  { %1250 = vmatprep.subr.bf16.mxu0 %v1525_v26 }
 0x973   :  { %1252 = vmatpush1.bf16.msra.mxu0 %v1535_v30 }
 0x974   :  { %1254 = vmatprep.subr.bf16.mxu0 %v1495_v7 }
 0xa39   :  { %v742_v51 = vpop.f32.mrb[2].mxu0 }
 0xa3a   :  { %v747_v52 = vadd.f32 %v742_v51, %v169_v47  ;;  %v744_v53 = vpop.f32.mrb[3].mxu0 }
 0xa3b   :  { %v748_v54 = vadd.f32 %v744_v53, %v171_v50 }
 0xa3c   :  { %v1146_v57 = vmul.f32 -1.442695, %v747_v52 }
 0xa3d   :  { %1370 = vtanh.f32 %v748_v54  ;;  %v1147_v2 = vmul.f32 -1.442695, %v748_v54 }
 0xa3e   :  { %1372 = vpow2.f32 %v1146_v57 }
 0xa47   :  { %v1371_v56 = vpop.eup %1370 }
 0xa48   :  { %764 = vrot.lane.b32.xlu0 %v1371_v56, %s1446_s22  ;;  %v1373_v58 = vpop.eup %1372 }
 0xa49   :  { %v755_v59 = vadd.f32 1.0, %v1373_v58 }
 0xa4b   :  { %1374 = vrcp.f32 %v755_v59  ;;  %v187_v59 = vadd.f32 %v1592_v46, %v1603_v55 }
 0xa55   :  { %v1375_v60 = vpop.eup %1374 }
 0xa56   :  { %v762_v37 = vmul.f32 %v1375_v60, %v661_v29 }
 0xaba   :  { %v765_v61 = vpop.permute.xlu0 %764 }
 0xabb   :  { %v767_v62 = vmul.f32 %v1375_v60, %v765_v61  ;;  %v189_v60 = vadd.f32 %v1597_v48, %v1599_v49 }
 0xabd   :  { %769 = vrot.lane.b32.xlu1 %v767_v62, %s1446_s22 }
 0xb2f   :  { %v770_v38 = vpop.permute.xlu1 %769 }
 0xb30   :  { %v772_v63 = vadd.f32 %v770_v38, %v762_v37 }
 0xb32   :  { %1376 = vtanh.f32 %v772_v63 }
 0xb33   :  { %1378 = vpow2.f32 %v1147_v2 }
 0xb3c   :  { %v1377_v1 = vpop.eup %1376 }
 0xb3d   :  { %775 = vrot.lane.b32.xlu0 %v1377_v1, %s1446_s22  ;;  %v1379_v3 = vpop.eup %1378 }
 0xb3e   :  { %v756_v4 = vadd.f32 1.0, %v1379_v3 }
 0xb40   :  { %1380 = vrcp.f32 %v756_v4 }
 0xb4a   :  { %v1381_v5 = vpop.eup %1380 }
 0xbaf   :  { %v776_v6 = vpop.permute.xlu0 %775 }
 0xbb0   :  { %v778_v8 = vmul.f32 %v1381_v5, %v776_v6 }
 0xbb2   :  { %1148 = vmatmul.mubr.msk.f32.vlgmr.msra.gmra.mrb[4].mxu0 %vm228_vm1, %v778_v8 }
 0xbb3   :  { %1256 = vmatpush1.bf16.msra.mxu0 %v1498_v9  ;;  %962 = vmatprep.mubr.f32.mxu0 %v1445_v0 }
 0xbb4   :  { %1258 = vmatprep.subr.bf16.mxu0 %v1505_v14 }
 0xbb7   :  { %1260 = vmatpush1.bf16.msra.mxu0 %v1508_v16 }
 0xbb8   :  { %1262 = vmatprep.subr.bf16.mxu0 %v1512_v19 }
 0xbbb   :  { %1264 = vmatpush1.bf16.msra.mxu0 %v1522_v25 }
 0xbbc   :  { %1266 = vmatprep.subr.bf16.mxu0 %v1525_v26 }
 0xbbf   :  { %1268 = vmatpush1.bf16.msra.mxu0 %v1535_v30 }
 0xbc0   :  { %1270 = vmatprep.subr.bf16.mxu0 %v1495_v7 }
 0xc85   :  { %v853_v12 = vpop.f32.mrb[4].mxu0 }
 0xc86   :  { %v858_v13 = vadd.f32 %v853_v12, %v175_v10  ;;  %v855_v15 = vpop.f32.mrb[5].mxu0 }
 0xc87   :  { %v859_v17 = vadd.f32 %v855_v15, %v177_v11 }
 0xc88   :  { %v1149_v20 = vmul.f32 -1.442695, %v858_v13 }
 0xc89   :  { %1382 = vtanh.f32 %v859_v17  ;;  %v1150_v35 = vmul.f32 -1.442695, %v859_v17 }
 0xc8a   :  { %1384 = vpow2.f32 %v1149_v20 }
 0xc93   :  { %v1383_v18 = vpop.eup %1382 }
 0xc94   :  { %875 = vrot.lane.b32.xlu1 %v1383_v18, %s1446_s22  ;;  %v1385_v21 = vpop.eup %1384 }
 0xc95   :  { %v866_v22 = vadd.f32 1.0, %v1385_v21 }
 0xc97   :  { %1386 = vrcp.f32 %v866_v22 }
 0xca1   :  { %v1387_v7 = vpop.eup %1386 }
 0xca2   :  { %v873_v40 = vmul.f32 %v1387_v7, %v772_v63 }
 0xd06   :  { %v876_v23 = vpop.permute.xlu1 %875 }
 0xd07   :  { %v878_v24 = vmul.f32 %v1387_v7, %v876_v23 }
 0xd09   :  { %880 = vrot.lane.b32.xlu0 %v878_v24, %s1446_s22 }
 0xd7b   :  { %v881_v41 = vpop.permute.xlu0 %880 }
 0xd7c   :  { %v883_v27 = vadd.f32 %v881_v41, %v873_v40 }
 0xd7e   :  { %1388 = vtanh.f32 %v883_v27 }
 0xd7f   :  { %1390 = vpow2.f32 %v1150_v35 }
 0xd88   :  { %v1389_v28 = vpop.eup %1388 }
 0xd89   :  { %886 = vrot.lane.b32.xlu1 %v1389_v28, %s1446_s22  ;;  %v1391_v36 = vpop.eup %1390 }
 0xd8a   :  { %v867_v29 = vadd.f32 1.0, %v1391_v36 }
 0xd8c   :  { %1392 = vrcp.f32 %v867_v29 }
 0xd96   :  { %v1393_v31 = vpop.eup %1392 }
 0xdfb   :  { %v887_v32 = vpop.permute.xlu1 %886 }
 0xdfc   :  { %v889_v33 = vmul.f32 %v1393_v31, %v887_v32 }
 0xdfe   :  { %1151 = vmatmul.mubr.msk.f32.vlgmr.msra.gmra.mrb[6].mxu0 %vm228_vm1, %v889_v33 }
 0xdff   :  { %1272 = vmatpush1.bf16.msra.mxu0 %v1498_v9  ;;  %1073 = vmatprep.mubr.f32.mxu0 %v1445_v0  ;;  %v183_v9 = vadd.f32 %v1590_v44, %v1599_v49 }
 0xe00   :  { %1274 = vmatprep.subr.bf16.mxu0 %v1505_v14 }
 0xe03   :  { %1276 = vmatpush1.bf16.msra.mxu0 %v1508_v16 }
 0xe04   :  { %1278 = vmatprep.subr.bf16.mxu0 %v1512_v19 }
 0xe07   :  { %1280 = vmatpush1.bf16.msra.mxu0 %v1522_v25 }
 0xe08   :  { %1282 = vmatprep.subr.bf16.mxu0 %v1525_v26 }
 0xe0b   :  { %1284 = vmatpush1.bf16.msra.mxu0 %v1535_v30 }
 0xed1   :  { %v964_v39 = vpop.f32.mrb[6].mxu0 }
 0xed2   :  { %v969_v0 = vadd.f32 %v964_v39, %v181_v34  ;;  %v966_v42 = vpop.f32.mrb[7].mxu0 }
 0xed3   :  { %v970_v14 = vadd.f32 %v966_v42, %v183_v9 }
 0xed4   :  { %v1152_v19 = vmul.f32 -1.442695, %v969_v0 }
 0xed5   :  { %1394 = vtanh.f32 %v970_v14  ;;  %v1153_v52 = vmul.f32 -1.442695, %v970_v14 }
 0xed6   :  { %1396 = vpow2.f32 %v1152_v19 }
 0xedf   :  { %v1395_v16 = vpop.eup %1394 }
 0xee0   :  { %986 = vrot.lane.b32.xlu0 %v1395_v16, %s1446_s22  ;;  %v1397_v25 = vpop.eup %1396 }
 0xee1   :  { %v977_v26 = vadd.f32 1.0, %v1397_v25 }
 0xee3   :  { %1398 = vrcp.f32 %v977_v26 }
 0xeed   :  { %v1399_v30 = vpop.eup %1398 }
 0xeee   :  { %v984_v43 = vmul.f32 %v1399_v30, %v883_v27 }
 0xf52   :  { %v987_v45 = vpop.permute.xlu0 %986 }
 0xf53   :  { %v989_v47 = vmul.f32 %v1399_v30, %v987_v45 }
 0xf55   :  { %991 = vrot.lane.b32.xlu1 %v989_v47, %s1446_s22 }
 0xfc7   :  { %v992_v44 = vpop.permute.xlu1 %991 }
 0xfc8   :  { %v994_v50 = vadd.f32 %v992_v44, %v984_v43 }
 0xfca   :  { %1400 = vtanh.f32 %v994_v50 }
 0xfcb   :  { %1402 = vpow2.f32 %v1153_v52 }
 0xfd4   :  { %v1401_v51 = vpop.eup %1400 }
 0xfd5   :  { %997 = vrot.lane.b32.xlu0 %v1401_v51, %s1446_s22  ;;  %v1403_v53 = vpop.eup %1402 }
 0xfd6   :  { %v978_v54 = vadd.f32 1.0, %v1403_v53 }
 0xfd8   :  { %1404 = vrcp.f32 %v978_v54 }
 0xfe2   :  { %v1405_v56 = vpop.eup %1404 }
0x1047   :  { %v998_v57 = vpop.permute.xlu0 %997 }
0x1048   :  { %v1000_v58 = vmul.f32 %v1405_v56, %v998_v57 }
0x104a   :  { %1154 = vmatmul.mubr.msk.f32.vlgmr.msra.gmra.mrb[8].mxu0 %vm228_vm1, %v1000_v58 }
0x111d   :  { %v1075_v61 = vpop.f32.mrb[8].mxu0 }
0x111e   :  { %v1080_v62 = vadd.f32 %v1075_v61, %v187_v59  ;;  %v1077_v37 = vpop.f32.mrb[9].mxu0 }
0x111f   :  { %v1081_v38 = vadd.f32 %v1077_v37, %v189_v60 }
0x1120   :  { %v1155_v1 = vmul.f32 -1.442695, %v1080_v62 }
0x1121   :  { %1406 = vtanh.f32 %v1081_v38  ;;  %v1156_v8 = vmul.f32 -1.442695, %v1081_v38 }
0x1122   :  { %1408 = vpow2.f32 %v1155_v1 }
0x112b   :  { %v1407_v63 = vpop.eup %1406 }
0x112c   :  { %1097 = vrot.lane.b32.xlu1 %v1407_v63, %s1446_s22  ;;  %v1409_v2 = vpop.eup %1408 }
0x112d   :  { %v1088_v3 = vadd.f32 1.0, %v1409_v2 }
0x112f   :  { %1410 = vrcp.f32 %v1088_v3 }
0x1139   :  { %v1411_v4 = vpop.eup %1410 }
0x113a   :  { %v1095_v46 = vmul.f32 %v1411_v4, %v994_v50 }
0x119e   :  { %v1098_v5 = vpop.permute.xlu1 %1097 }
0x119f   :  { %v1100_v6 = vmul.f32 %v1411_v4, %v1098_v5 }
0x11a1   :  { %1102 = vrot.lane.b32.xlu0 %v1100_v6, %s1446_s22 }
0x1213   :  { %v1103_v48 = vpop.permute.xlu0 %1102 }
0x1214   :  { %v1105_v49 = vadd.f32 %v1103_v48, %v1095_v46 }
0x1216   :  { %1412 = vtanh.f32 %v1105_v49 }
0x1217   :  { %1414 = vpow2.f32 %v1156_v8 }
0x1220   :  { %v1413_v55 = vpop.eup %1412 }
0x1221   :  { %1108 = vrot.lane.b32.xlu1 %v1413_v55, %s1446_s22  ;;  %v1415_v10 = vpop.eup %1414 }
0x1222   :  { %v1089_v11 = vadd.f32 1.0, %v1415_v10 }
0x1224   :  { %1416 = vrcp.f32 %v1089_v11 }
0x122e   :  { %v1417_v12 = vpop.eup %1416 }
0x1293   :  { %v1109_v13 = vpop.permute.xlu1 %1108 }
0x1294   :  { %v1111_v15 = vmul.f32 %v1417_v12, %v1109_v13 }
0x1296   :  { %v1112_v17 = vsel %vm228_vm1, %v1111_v15, %v1105_v49 }
0x1297   :  { %1113 = vst [vmem:[%s1711_s4] sm:$0xff] %v1112_v17 }
0x1298   :  { %1118 = vsyncpa [#allocation4], 1 }

</bundles_post_ra>
